<compile_context>
chip_gen: v7x
topology: tpu7x:2x2x1
jax: 0.10.0
libtpu: 0.0.40
codegen_flags: <defaults>
</compile_context>

<pallas_src>
import functools

import jax
import jax.numpy as jnp
from jax.experimental import pallas as pl
from jax.experimental.pallas import tpu as pltpu

_LN_EPS = 1e-5


def _round_up(n, m):
    return ((n + m - 1) // m) * m


# ---------------------------------------------------------------------------
# Pallas kernel: fused (proj + mask_proj) matmul + bias + LayerNorm
# ---------------------------------------------------------------------------
def _patch_embed_kernel(xp_ref, w_ref, bias_ref, g_ref, b_ref, o_ref, *,
                        d_true, n_pad_lanes):
    # xp_ref : (T, Kp)   bf16, im2col'd (image ++ mask) patches, zero-padded K
    # w_ref  : (Kp, Dp)  bf16, stacked (proj ++ mask_proj) weight, zero-padded
    # bias   : (1, Dp)   f32, b_proj + b_mask, zero-padded
    # g, b   : (1, Dp)   f32, LayerNorm gamma / beta, zero-padded
    y = jnp.dot(xp_ref[...], w_ref[...], preferred_element_type=jnp.float32)
    y = y + bias_ref[...]

    # Pad lanes of y are exactly 0 (weight & bias zero-padded), so:
    #   sum(y)            over Dp lanes == sum over the true D lanes
    #   sum((y - mean)^2) over Dp lanes == true sum + n_pad_lanes * mean^2
    inv_d = 1.0 / d_true
    mean = jnp.sum(y, axis=-1, keepdims=True) * inv_d
    ss = jnp.sum(jnp.square(y - mean), axis=-1, keepdims=True)
    var = (ss - n_pad_lanes * jnp.square(mean)) * inv_d
    r = jax.lax.rsqrt(var + _LN_EPS)                 # (T, 1) on the EUP
    o_ref[...] = (y - mean) * r * g_ref[...] + b_ref[...]


# ---------------------------------------------------------------------------
# im2col glue (valid because stride == patch_size)
# ---------------------------------------------------------------------------
def _im2col(x_nchw, patch, pad):
    B, C, H, W = x_nchw.shape
    xpad = jnp.pad(x_nchw, ((0, 0), (0, 0), (pad, pad), (pad, pad)))
    Hp, Wp = H + 2 * pad, W + 2 * pad
    assert Hp % patch == 0 and Wp % patch == 0
    Ho, Wo = Hp // patch, Wp // patch
    x = xpad.reshape(B, C, Ho, patch, Wo, patch)
    x = x.transpose(0, 2, 4, 1, 3, 5)                # (B, Ho, Wo, C, kh, kw)
    return x.reshape(B * Ho * Wo, C * patch * patch), Ho, Wo


# ---------------------------------------------------------------------------
# Forward (jitted so weight reshapes / pads are folded into one XLA program)
# ---------------------------------------------------------------------------
@functools.partial(jax.jit, static_argnames=("patch_size",))
def _forward(x, mask, params, patch_size):
    pad = patch_size // 2
    B = x.shape[0]
    D = params["w_proj"].shape[0]

    # One im2col pass over (image ++ mask) channels, cast to bf16 first so the
    # pad+transpose relayout moves half the bytes.
    x_cat = jnp.concatenate([x, mask], axis=1).astype(jnp.bfloat16)
    xp, Ho, Wo = _im2col(x_cat, patch_size, pad)
    Nt, K = xp.shape

    # Stacked weights in the matching (C ++ Cm, kh, kw) flattening order.
    w_cat = jnp.concatenate([params["w_proj"], params["w_mask"]],
                            axis=1).reshape(D, K).T          # (K, D)
    bias = (params["b_proj"] + params["b_mask"]).reshape(1, D)
    gamma = params["ln_gamma"].reshape(1, D)
    beta = params["ln_beta"].reshape(1, D)

    # Lane/sublane-aligned padding.
    Kp = _round_up(K, 128)
    Dp = _round_up(D, 128)
    tile_n = min(1024, _round_up(Nt, 16))
    Ntp = _round_up(Nt, tile_n)

    xp = jnp.pad(xp, ((0, Ntp - Nt), (0, Kp - K)))
    w_cat = jnp.pad(w_cat.astype(jnp.bfloat16), ((0, Kp - K), (0, Dp - D)))
    bias = jnp.pad(bias.astype(jnp.float32), ((0, 0), (0, Dp - D)))
    gamma = jnp.pad(gamma.astype(jnp.float32), ((0, 0), (0, Dp - D)))
    beta = jnp.pad(beta.astype(jnp.float32), ((0, 0), (0, Dp - D)))

    kernel = functools.partial(_patch_embed_kernel,
                               d_true=D, n_pad_lanes=Dp - D)

    out = pl.pallas_call(
        kernel,
        out_shape=jax.ShapeDtypeStruct((Ntp, Dp), jnp.float32),
        grid=(Ntp // tile_n,),
        in_specs=[
            pl.BlockSpec((tile_n, Kp), lambda i: (i, 0)),   # streamed rows
            pl.BlockSpec((Kp, Dp), lambda i: (0, 0)),       # resident weight
            pl.BlockSpec((1, Dp), lambda i: (0, 0)),        # resident bias
            pl.BlockSpec((1, Dp), lambda i: (0, 0)),        # resident gamma
            pl.BlockSpec((1, Dp), lambda i: (0, 0)),        # resident beta
        ],
        out_specs=pl.BlockSpec((tile_n, Dp), lambda i: (i, 0)),
        compiler_params=pltpu.CompilerParams(
            dimension_semantics=("parallel",),
            vmem_limit_bytes=32 * 1024 * 1024),
    )(xp, w_cat, bias, gamma, beta)

    return out[:Nt, :D].reshape(B, Ho * Wo, D)


def modified_patch_embed(x, mask, params, patch_size=4, stride=4):
    """Forward pass of ModifiedPatchEmbed. Returns (out[B,N,D], H_out, W_out)."""
    assert stride == patch_size, "kernel assumes stride == patch_size (module default)"
    # TODO(synk): only the (x.dim()==4, mask provided) branch of the PyTorch
    # forward is implemented; other input ranks are not supported here.
    pad = patch_size // 2
    Ho = (x.shape[2] + 2 * pad) // patch_size
    Wo = (x.shape[3] + 2 * pad) // patch_size
    out = _forward(x, mask, params, patch_size=patch_size)
    return out, Ho, Wo


# ---------------------------------------------------------------------------
# Plain-JAX f32 reference (same math, no Pallas) for a sanity check
# ---------------------------------------------------------------------------
def _reference(x, mask, params, patch_size=4):
    pad = patch_size // 2
    B = x.shape[0]
    D = params["w_proj"].shape[0]
    xp, Ho, Wo = _im2col(x.astype(jnp.float32), patch_size, pad)
    mp, _, _ = _im2col(mask.astype(jnp.float32), patch_size, pad)
    K, Km = xp.shape[-1], mp.shape[-1]
    y = xp @ params["w_proj"].reshape(D, K).T + params["b_proj"]
    y = y + mp @ params["w_mask"].reshape(D, Km).T + params["b_mask"]
    mean = y.mean(-1, keepdims=True)
    var = ((y - mean) ** 2).mean(-1, keepdims=True)
    y = (y - mean) / jnp.sqrt(var + _LN_EPS) * params["ln_gamma"] + params["ln_beta"]
    return y.reshape(B, Ho * Wo, D), Ho, Wo


if __name__ == "__main__":
    # Small, module-consistent shapes.
    B, in_chans, img_size = 2, 4, 16
    patch_size = stride = 4
    embed_dim = 32
    mask_chans = 2

    key = jax.random.PRNGKey(0)
    k0, k1, k2, k3 = jax.random.split(key, 4)

    x = jax.random.normal(k0, (B, in_chans, img_size, img_size), jnp.float32)
    mask = jax.random.normal(k1, (B, mask_chans, img_size, img_size), jnp.float32)

    params = {
        # proj conv: (embed_dim, in_chans, k, k)
        "w_proj": 0.05 * jax.random.normal(
            k2, (embed_dim, in_chans, patch_size, patch_size), jnp.float32),
        "b_proj": 0.01 * jax.random.normal(k3, (embed_dim,), jnp.float32),
        # mask_proj conv is zero-initialized per the module's __init__
        "w_mask": jnp.zeros((embed_dim, mask_chans, patch_size, patch_size),
                            jnp.float32),
        "b_mask": jnp.zeros((embed_dim,), jnp.float32),
        # LayerNorm default init (ones / zeros)
        "ln_gamma": jnp.ones((embed_dim,), jnp.float32),
        "ln_beta": jnp.zeros((embed_dim,), jnp.float32),
    }

    out, Ho, Wo = modified_patch_embed(x, mask, params,
                                       patch_size=patch_size, stride=stride)
    out = jax.block_until_ready(out)

    ref, Ho_r, Wo_r = _reference(x, mask, params, patch_size=patch_size)
    assert (Ho, Wo) == (Ho_r, Wo_r) == (5, 5)
    assert out.shape == (B, Ho * Wo, embed_dim)
    assert jnp.allclose(out, ref, atol=3e-2, rtol=3e-2), (
        float(jnp.max(jnp.abs(out - ref))))

    print("KERNEL_OK")
</pallas_src>

<mosaic_0001>
module attributes {stable_mosaic.version = 11 : i64} {
  func.func @_patch_embed_kernel(%arg0: i32, %arg1: memref<64x128xbf16, #tpu.memory_space<vmem>>, %arg2: memref<128x128xbf16, #tpu.memory_space<vmem>>, %arg3: memref<1x128xf32, #tpu.memory_space<vmem>>, %arg4: memref<1x128xf32, #tpu.memory_space<vmem>>, %arg5: memref<1x128xf32, #tpu.memory_space<vmem>>, %arg6: memref<64x128xf32, #tpu.memory_space<vmem>>) attributes {dimension_semantics = [#tpu.dimension_semantics<parallel>], iteration_bounds = array<i64: 1>, scalar_prefetch = 0 : i64, scratch_operands = 0 : i64, tpu.core_type = #tpu.core_type<tc>, window_params = [{transform_indices = @transform_0, window_bounds = array<i64: 64, 128>}, {pipeline_mode = #tpu.pipeline_mode<synchronous>, transform_indices = @transform_1, window_bounds = array<i64: 128, 128>}, {pipeline_mode = #tpu.pipeline_mode<synchronous>, transform_indices = @transform_2, window_bounds = array<i64: 1, 128>}, {pipeline_mode = #tpu.pipeline_mode<synchronous>, transform_indices = @transform_3, window_bounds = array<i64: 1, 128>}, {pipeline_mode = #tpu.pipeline_mode<synchronous>, transform_indices = @transform_4, window_bounds = array<i64: 1, 128>}, {transform_indices = @transform_5, window_bounds = array<i64: 64, 128>}]} {
    %c0 = arith.constant 0 : index
    %c0_0 = arith.constant 0 : index
    %0 = vector.load %arg1[%c0, %c0_0] : memref<64x128xbf16, #tpu.memory_space<vmem>>, vector<64x128xbf16>
    %c0_1 = arith.constant 0 : index
    %c0_2 = arith.constant 0 : index
    %1 = vector.load %arg2[%c0_1, %c0_2] : memref<128x128xbf16, #tpu.memory_space<vmem>>, vector<128x128xbf16>
    %cst = arith.constant dense<0.000000e+00> : vector<64x128xf32>
    %2 = tpu.matmul %0, %1, %cst {dimension_numbers = #tpu.dot_dimension_numbers<[1], [0], [0], [1], [0, 0, 1, 1], [], []>} : vector<64x128xbf16>, vector<128x128xbf16>, vector<64x128xf32> -> vector<64x128xf32>
    %c0_3 = arith.constant 0 : index
    %c0_4 = arith.constant 0 : index
    %3 = vector.load %arg3[%c0_3, %c0_4] : memref<1x128xf32, #tpu.memory_space<vmem>>, vector<1x128xf32>
    %4 = vector.broadcast %3 : vector<1x128xf32> to vector<64x128xf32>
    %5 = arith.addf %2, %4 : vector<64x128xf32>
    %cst_5 = arith.constant dense<0.000000e+00> : vector<64xf32>
    %6 = vector.multi_reduction <add>, %5, %cst_5 [1] : vector<64x128xf32> to vector<64xf32>
    %7 = vector.shape_cast %6 : vector<64xf32> to vector<64x1xf32>
    %cst_6 = arith.constant 3.125000e-02 : f32
    %8 = vector.broadcast %cst_6 : f32 to vector<64x1xf32>
    %9 = arith.mulf %7, %8 : vector<64x1xf32>
    %10 = vector.broadcast %9 : vector<64x1xf32> to vector<64x128xf32>
    %11 = arith.subf %5, %10 : vector<64x128xf32>
    %12 = arith.mulf %11, %11 : vector<64x128xf32>
    %cst_7 = arith.constant dense<0.000000e+00> : vector<64xf32>
    %13 = vector.multi_reduction <add>, %12, %cst_7 [1] : vector<64x128xf32> to vector<64xf32>
    %14 = vector.shape_cast %13 : vector<64xf32> to vector<64x1xf32>
    %15 = arith.mulf %9, %9 : vector<64x1xf32>
    %cst_8 = arith.constant 9.600000e+01 : f32
    %16 = vector.broadcast %cst_8 : f32 to vector<64x1xf32>
    %17 = arith.mulf %16, %15 : vector<64x1xf32>
    %18 = arith.subf %14, %17 : vector<64x1xf32>
    %cst_9 = arith.constant 3.125000e-02 : f32
    %19 = vector.broadcast %cst_9 : f32 to vector<64x1xf32>
    %20 = arith.mulf %18, %19 : vector<64x1xf32>
    %cst_10 = arith.constant 9.99999974E-6 : f32
    %21 = vector.broadcast %cst_10 : f32 to vector<64x1xf32>
    %22 = arith.addf %20, %21 : vector<64x1xf32>
    %23 = math.rsqrt %22 : vector<64x1xf32>
    %24 = vector.broadcast %9 : vector<64x1xf32> to vector<64x128xf32>
    %25 = arith.subf %5, %24 : vector<64x128xf32>
    %26 = vector.broadcast %23 : vector<64x1xf32> to vector<64x128xf32>
    %27 = arith.mulf %25, %26 : vector<64x128xf32>
    %c0_11 = arith.constant 0 : index
    %c0_12 = arith.constant 0 : index
    %28 = vector.load %arg4[%c0_11, %c0_12] : memref<1x128xf32, #tpu.memory_space<vmem>>, vector<1x128xf32>
    %29 = vector.broadcast %28 : vector<1x128xf32> to vector<64x128xf32>
    %30 = arith.mulf %27, %29 : vector<64x128xf32>
    %c0_13 = arith.constant 0 : index
    %c0_14 = arith.constant 0 : index
    %31 = vector.load %arg5[%c0_13, %c0_14] : memref<1x128xf32, #tpu.memory_space<vmem>>, vector<1x128xf32>
    %32 = vector.broadcast %31 : vector<1x128xf32> to vector<64x128xf32>
    %33 = arith.addf %30, %32 : vector<64x128xf32>
    %c0_15 = arith.constant 0 : index
    %c0_16 = arith.constant 0 : index
    %34 = vector.load %arg6[%c0_15, %c0_16] : memref<64x128xf32, #tpu.memory_space<vmem>>, vector<64x128xf32>
    tpu.vector_store %arg6[%c0_15, %c0_16], %33 {strides = array<i32>} : memref<64x128xf32, #tpu.memory_space<vmem>>, vector<64x128xf32>,
    return
  }
  func.func @transform_0(%arg0: i32) -> (i32, i32) {
    %c0_i32 = arith.constant 0 : i32
    %c0_i32_0 = arith.constant 0 : i32
    return %arg0, %c0_i32 : i32, i32
  }
  func.func @transform_1(%arg0: i32) -> (i32, i32) {
    %c0_i32 = arith.constant 0 : i32
    %c0_i32_0 = arith.constant 0 : i32
    %c0_i32_1 = arith.constant 0 : i32
    return %c0_i32, %c0_i32_0 : i32, i32
  }
  func.func @transform_2(%arg0: i32) -> (i32, i32) {
    %c0_i32 = arith.constant 0 : i32
    %c0_i32_0 = arith.constant 0 : i32
    %c0_i32_1 = arith.constant 0 : i32
    return %c0_i32, %c0_i32_0 : i32, i32
  }
  func.func @transform_3(%arg0: i32) -> (i32, i32) {
    %c0_i32 = arith.constant 0 : i32
    %c0_i32_0 = arith.constant 0 : i32
    %c0_i32_1 = arith.constant 0 : i32
    return %c0_i32, %c0_i32_0 : i32, i32
  }
  func.func @transform_4(%arg0: i32) -> (i32, i32) {
    %c0_i32 = arith.constant 0 : i32
    %c0_i32_0 = arith.constant 0 : i32
    %c0_i32_1 = arith.constant 0 : i32
    return %c0_i32, %c0_i32_0 : i32, i32
  }
  func.func @transform_5(%arg0: i32) -> (i32, i32) {
    %c0_i32 = arith.constant 0 : i32
    %c0_i32_0 = arith.constant 0 : i32
    return %arg0, %c0_i32 : i32, i32
  }
}

</mosaic_0001>

<bundles_post_ra>
// kernel: _forward.1
= control target key start
LH: loop header
LB: loop body
LE: loop exit
PB: predicated region body
PF: predicated region fallthrough
CT: control target
= control target key end

     0   :  { %s577_s1 = inlined_call_operand.vmem [shape: bf16[128,128], index: 1, kind: input, shape index: {}]   ;;  %s578_s0 = inlined_call_operand.vmem [shape: bf16[64,128], index: 0, kind: input, shape index: {}]   ;;  %s579_s2 = inlined_call_operand.vmem [shape: f32[1,128], index: 2, kind: input, shape index: {}]   ;;  %s580_s3 = inlined_call_operand.vmem [shape: f32[1,128], index: 3, kind: input, shape index: {}]   ;;  %s581_s4 = inlined_call_operand.vmem [shape: f32[1,128], index: 4, kind: input, shape index: {}]   ;;  %s582_s5 = inlined_call_operand.vmem [shape: f32[64,128], index: 5, kind: output, shape index: {}]  }
   0x1   :  { %v410_v0 = vld [vmem:[%s577_s1] sm:$0xff]   ;;  %v411_v1 = vld [vmem:[%s577_s1 + $0x8] sm:$0xff]   ;;  %v412_v2 = vld [vmem:[%s577_s1 + $0x10] sm:$0xff]  }
   0x2   :  { %370 = vmatprep.subr.bf16.mxu0 %v410_v0  ;;  %394 = vmatprep.subr.bf16.mxu1 %v410_v0  ;;  %v413_v3 = vld [vmem:[%s577_s1 + $0x18] sm:$0xff]   ;;  %v418_v4 = vld [vmem:[%s578_s0] sm:$0xff]   ;;  %v420_v5 = vld [vmem:[%s578_s0 + $0x10] sm:$0xff]  }
   0x3   :  { %371 = vmatpush3.bf16.msra.mxu0 %v410_v0  ;;  %402 = vmatpush3.bf16.msra.mxu1 %v410_v0  ;;  %v414_v6 = vld [vmem:[%s577_s1 + $0x20] sm:$0xff]   ;;  %v415_v7 = vld [vmem:[%s577_s1 + $0x28] sm:$0xff]   ;;  %v416_v8 = vld [vmem:[%s577_s1 + $0x30] sm:$0xff]  }
   0x4   :  { %372 = vmatprep.subr.bf16.mxu0 %v411_v1  ;;  %395 = vmatprep.subr.bf16.mxu1 %v411_v1  ;;  %v417_v9 = vld [vmem:[%s577_s1 + $0x38] sm:$0xff]   ;;  %v419_v10 = vld [vmem:[%s578_s0 + $0x8] sm:$0xff]   ;;  %v343_v12 = vld [vmem:[%s579_s2] ss:$0 sm:$0xff] }
   0x5   :  { %386 = vmatprep.mubr.bf16.mxu0 %v418_v4  ;;  %390 = vmatprep.mubr.bf16.mxu1 %v420_v5  ;;  %v421_v11 = vld [vmem:[%s578_s0 + $0x18] sm:$0xff]  }
   0x7   :  { %373 = vmatpush3.bf16.msra.mxu0 %v411_v1  ;;  %403 = vmatpush3.bf16.msra.mxu1 %v411_v1 }
   0x8   :  { %374 = vmatprep.subr.bf16.mxu0 %v412_v2  ;;  %396 = vmatprep.subr.bf16.mxu1 %v412_v2 }
   0xb   :  { %375 = vmatpush3.bf16.msra.mxu0 %v412_v2  ;;  %404 = vmatpush3.bf16.msra.mxu1 %v412_v2 }
   0xc   :  { %376 = vmatprep.subr.bf16.mxu0 %v413_v3  ;;  %397 = vmatprep.subr.bf16.mxu1 %v413_v3 }
   0xf   :  { %377 = vmatpush3.bf16.msra.mxu0 %v413_v3  ;;  %405 = vmatpush3.bf16.msra.mxu1 %v413_v3 }
  0x10   :  { %378 = vmatprep.subr.bf16.mxu0 %v414_v6  ;;  %398 = vmatprep.subr.bf16.mxu1 %v414_v6 }
  0x13   :  { %379 = vmatpush3.bf16.msra.mxu0 %v414_v6  ;;  %406 = vmatpush3.bf16.msra.mxu1 %v414_v6 }
  0x14   :  { %380 = vmatprep.subr.bf16.mxu0 %v415_v7  ;;  %399 = vmatprep.subr.bf16.mxu1 %v415_v7 }
  0x17   :  { %381 = vmatpush3.bf16.msra.mxu0 %v415_v7  ;;  %407 = vmatpush3.bf16.msra.mxu1 %v415_v7 }
  0x18   :  { %382 = vmatprep.subr.bf16.mxu0 %v416_v8  ;;  %400 = vmatprep.subr.bf16.mxu1 %v416_v8 }
  0x1b   :  { %383 = vmatpush3.bf16.msra.mxu0 %v416_v8  ;;  %408 = vmatpush3.bf16.msra.mxu1 %v416_v8 }
  0x1c   :  { %384 = vmatprep.subr.bf16.mxu0 %v417_v9  ;;  %401 = vmatprep.subr.bf16.mxu1 %v417_v9 }
  0x1f   :  { %385 = vmatpush3.bf16.msra.mxu0 %v417_v9  ;;  %409 = vmatpush3.bf16.msra.mxu1 %v417_v9 }
  0x22   :  { %387 = vmatmul.mubr.bf16.vlgmr.msra.gmra.mrb[0].mxu0 %v419_v10  ;;  %391 = vmatmul.mubr.bf16.vlgmr.msra.gmra.mrb[0].mxu1 %v421_v11 }
  0xf5   :  { %v388_v13 = vpop.f32.mrb[0].mxu0  ;;  %v392_v14 = vpop.f32.mrb[0].mxu1 }
  0xf6   :  { %v167_v15 = vadd.f32 %v388_v13, %v343_v12  ;;  %v158_v16 = vpop.f32.mrb[1].mxu0  ;;  %v174_v17 = vpop.f32.mrb[1].mxu1  ;;  %v183_v28 = vadd.f32 %v392_v14, %v343_v12 }
  0xf7   :  { %v159_v18 = vadd.f32 %v343_v12, %v158_v16  ;;  %v389_v19 = vpop.f32.mrb[2].mxu0  ;;  %v393_v20 = vpop.f32.mrb[2].mxu1  ;;  %v175_v23 = vadd.f32 %v343_v12, %v174_v17 }
  0xf8   :  { %193 = vadd.xlane.f32.xlu1 %v167_v15  ;;  %v161_v21 = vpop.f32.mrb[3].mxu0  ;;  %v177_v22 = vpop.f32.mrb[3].mxu1  ;;  %v170_v24 = vadd.f32 %v389_v19, %v343_v12  ;;  %v186_v27 = vadd.f32 %v393_v20, %v343_v12 }
  0xf9   :  { %189 = vadd.xlane.f32.xlu0 %v159_v18  ;;  %v178_v25 = vadd.f32 %v343_v12, %v177_v22  ;;  %v162_v26 = vadd.f32 %v343_v12, %v161_v21 }
  0xfc   :  { %195 = vadd.xlane.f32.xlu1 %v170_v24 }
  0xfd   :  { %197 = vadd.xlane.f32.xlu0 %v175_v23 }
 0x100   :  { %199 = vadd.xlane.f32.xlu1 %v178_v25 }
 0x101   :  { %191 = vadd.xlane.f32.xlu0 %v162_v26 }
 0x104   :  { %203 = vadd.xlane.f32.xlu1 %v186_v27 }
 0x105   :  { %201 = vadd.xlane.f32.xlu0 %v183_v28 }
 0x185   :  { %v194_v29 = vpop.xlane.xlu1 %193 }
 0x186   :  { %v207_v30 = vmul.f32 0.03125, %v194_v29  ;;  %v190_v31 = vpop.xlane.xlu0 %189 }
 0x187   :  { %v205_v32 = vmul.f32 0.03125, %v190_v31 }
 0x188   :  { %v507_v33 = vsub.f32 %v167_v15, %v207_v30  ;;  %v247_v61 = vmul.f32 %v207_v30, %v207_v30 }
 0x189   :  { %v196_v34 = vpop.xlane.xlu1 %195  ;;  %v509_v35 = vsub.f32 %v159_v18, %v205_v32  ;;  %v245_v62 = vmul.f32 %v205_v32, %v205_v32 }
 0x18a   :  { %v208_v36 = vmul.f32 0.03125, %v196_v34  ;;  %v198_v37 = vpop.xlane.xlu0 %197  ;;  %v223_v38 = vmul.f32 %v507_v33, %v507_v33  ;;  %v255_v0 = vmul.f32 96.0, %v247_v61 }
 0x18b   :  { %v209_v39 = vmul.f32 0.03125, %v198_v37  ;;  %v221_v45 = vmul.f32 %v509_v35, %v509_v35  ;;  %v253_v6 = vmul.f32 96.0, %v245_v62 }
 0x18c   :  { %v513_v40 = vsub.f32 %v170_v24, %v208_v36  ;;  %233 = vadd.xlane.f32.xlu0 %v223_v38  ;;  %v248_v63 = vmul.f32 %v208_v36, %v208_v36 }
 0x18d   :  { %v200_v41 = vpop.xlane.xlu1 %199  ;;  %v515_v42 = vsub.f32 %v175_v23, %v209_v39  ;;  %v249_v3 = vmul.f32 %v209_v39, %v209_v39 }
 0x18e   :  { %v192_v43 = vpop.xlane.xlu0 %191  ;;  %v224_v44 = vmul.f32 %v513_v40, %v513_v40  ;;  %v210_v46 = vmul.f32 0.03125, %v200_v41  ;;  %v256_v5 = vmul.f32 96.0, %v248_v63 }
 0x18f   :  { %v206_v47 = vmul.f32 0.03125, %v192_v43  ;;  %v225_v51 = vmul.f32 %v515_v42, %v515_v42  ;;  %v257_v13 = vmul.f32 96.0, %v249_v3 }
 0x190   :  { %235 = vadd.xlane.f32.xlu1 %v224_v44  ;;  %229 = vadd.xlane.f32.xlu0 %v221_v45  ;;  %v525_v52 = vsub.f32 %v178_v25, %v210_v46  ;;  %v250_v14 = vmul.f32 %v210_v46, %v210_v46  ;;  %v356_v44 = vld [vmem:[%s580_s3] ss:$0 sm:$0xff] }
 0x191   :  { %v521_v48 = vsub.f32 %v162_v26, %v206_v47  ;;  %v204_v49 = vpop.xlane.xlu1 %203  ;;  %v246_v7 = vmul.f32 %v206_v47, %v206_v47 }
 0x192   :  { %v202_v50 = vpop.xlane.xlu0 %201  ;;  %v212_v53 = vmul.f32 0.03125, %v204_v49  ;;  %v226_v58 = vmul.f32 %v525_v52, %v525_v52  ;;  %v258_v26 = vmul.f32 96.0, %v250_v14 }
 0x193   :  { %v211_v54 = vmul.f32 0.03125, %v202_v50  ;;  %v222_v55 = vmul.f32 %v521_v48, %v521_v48  ;;  %v254_v19 = vmul.f32 96.0, %v246_v7 }
 0x194   :  { %237 = vadd.xlane.f32.xlu0 %v225_v51  ;;  %v531_v57 = vsub.f32 %v186_v27, %v212_v53  ;;  %v252_v27 = vmul.f32 %v212_v53, %v212_v53  ;;  %v357_v51 = vld [vmem:[%s581_s4] ss:$0 sm:$0xff] }
 0x195   :  { %v529_v56 = vsub.f32 %v183_v28, %v211_v54  ;;  %231 = vadd.xlane.f32.xlu1 %v222_v55  ;;  %v251_v17 = vmul.f32 %v211_v54, %v211_v54 }
 0x196   :  { %v228_v60 = vmul.f32 %v531_v57, %v531_v57  ;;  %v260_v41 = vmul.f32 96.0, %v252_v27 }
 0x197   :  { %v227_v59 = vmul.f32 %v529_v56, %v529_v56  ;;  %v259_v29 = vmul.f32 96.0, %v251_v17 }
 0x199   :  { %239 = vadd.xlane.f32.xlu1 %v226_v58  ;;  %241 = vadd.xlane.f32.xlu0 %v227_v59 }
 0x19d   :  { %243 = vadd.xlane.f32.xlu1 %v228_v60 }
 0x219   :  { %v234_v1 = vpop.xlane.xlu0 %233 }
 0x21a   :  { %v263_v2 = vsub.f32 %v234_v1, %v255_v0 }
 0x21c   :  { %v271_v4 = vmul.f32 0.03125, %v263_v2 }
 0x21d   :  { %v236_v8 = vpop.xlane.xlu1 %235  ;;  %v230_v9 = vpop.xlane.xlu0 %229 }
 0x21e   :  { %v279_v10 = vadd.f32 1e-05, %v271_v4  ;;  %v264_v11 = vsub.f32 %v236_v8, %v256_v5  ;;  %v261_v12 = vsub.f32 %v230_v9, %v253_v6 }
 0x220   :  { %422 = vrsqrt.f32 %v279_v10  ;;  %v272_v15 = vmul.f32 0.03125, %v264_v11  ;;  %v269_v16 = vmul.f32 0.03125, %v261_v12 }
 0x221   :  { %v238_v18 = vpop.xlane.xlu0 %237 }
 0x222   :  { %v280_v20 = vadd.f32 1e-05, %v272_v15  ;;  %v277_v21 = vadd.f32 1e-05, %v269_v16  ;;  %v265_v22 = vsub.f32 %v238_v18, %v257_v13  ;;  %v232_v23 = vpop.xlane.xlu1 %231 }
 0x223   :  { %v262_v24 = vsub.f32 %v232_v23, %v254_v19 }
 0x224   :  { %424 = vrsqrt.f32 %v280_v20  ;;  %v273_v25 = vmul.f32 0.03125, %v265_v22 }
 0x225   :  { %426 = vrsqrt.f32 %v277_v21  ;;  %v270_v28 = vmul.f32 0.03125, %v262_v24 }
 0x226   :  { %v281_v30 = vadd.f32 1e-05, %v273_v25  ;;  %v240_v31 = vpop.xlane.xlu1 %239  ;;  %v242_v32 = vpop.xlane.xlu0 %241 }
 0x227   :  { %v278_v34 = vadd.f32 1e-05, %v270_v28  ;;  %v266_v36 = vsub.f32 %v240_v31, %v258_v26  ;;  %v267_v37 = vsub.f32 %v242_v32, %v259_v29 }
 0x228   :  { %428 = vrsqrt.f32 %v281_v30 }
 0x229   :  { %430 = vrsqrt.f32 %v278_v34  ;;  %v274_v38 = vmul.f32 0.03125, %v266_v36  ;;  %v275_v39 = vmul.f32 0.03125, %v267_v37 }
 0x22a   :  { %v423_v43 = vpop.eup %422  ;;  %v244_v45 = vpop.xlane.xlu1 %243 }
 0x22b   :  { %v295_v46 = vmul.f32 %v423_v43, %v507_v33  ;;  %v282_v47 = vadd.f32 1e-05, %v274_v38  ;;  %v283_v49 = vadd.f32 1e-05, %v275_v39  ;;  %v268_v50 = vsub.f32 %v244_v45, %v260_v41 }
 0x22d   :  { %v310_v53 = vmul.f32 %v356_v44, %v295_v46  ;;  %432 = vrsqrt.f32 %v282_v47  ;;  %v276_v54 = vmul.f32 0.03125, %v268_v50 }
 0x22e   :  { %v425_v55 = vpop.eup %424  ;;  %434 = vrsqrt.f32 %v283_v49 }
 0x22f   :  { %v427_v58 = vpop.eup %426  ;;  %v325_v59 = vadd.f32 %v357_v51, %v310_v53  ;;  %v296_v60 = vmul.f32 %v425_v55, %v513_v40  ;;  %v284_v61 = vadd.f32 1e-05, %v276_v54 }
 0x230   :  { %v293_v62 = vmul.f32 %v427_v58, %v509_v35 }
 0x231   :  { %333 = vst [vmem:[%s582_s5 + $0x10] sm:$0xff] %v325_v59  ;;  %v311_v33 = vmul.f32 %v356_v44, %v296_v60  ;;  %436 = vrsqrt.f32 %v284_v61 }
 0x232   :  { %v429_v63 = vpop.eup %428  ;;  %v308_v0 = vmul.f32 %v356_v44, %v293_v62 }
 0x233   :  { %v431_v1 = vpop.eup %430  ;;  %v326_v2 = vadd.f32 %v357_v51, %v311_v33  ;;  %v297_v3 = vmul.f32 %v429_v63, %v515_v42 }
 0x234   :  { %v323_v4 = vadd.f32 %v357_v51, %v308_v0  ;;  %v294_v5 = vmul.f32 %v431_v1, %v521_v48 }
 0x235   :  { %334 = vst [vmem:[%s582_s5 + $0x18] sm:$0xff] %v326_v2  ;;  %v312_v35 = vmul.f32 %v356_v44, %v297_v3 }
 0x236   :  { %331 = vst [vmem:[%s582_s5] sm:$0xff] %v323_v4  ;;  %v309_v40 = vmul.f32 %v356_v44, %v294_v5 }
 0x237   :  { %v433_v6 = vpop.eup %432  ;;  %v327_v7 = vadd.f32 %v357_v51, %v312_v35 }
 0x238   :  { %v435_v8 = vpop.eup %434  ;;  %v324_v9 = vadd.f32 %v357_v51, %v309_v40  ;;  %v298_v10 = vmul.f32 %v433_v6, %v525_v52 }
 0x239   :  { %335 = vst [vmem:[%s582_s5 + $0x20] sm:$0xff] %v327_v7  ;;  %v299_v42 = vmul.f32 %v435_v8, %v529_v56 }
 0x23a   :  { %332 = vst [vmem:[%s582_s5 + $0x8] sm:$0xff] %v324_v9  ;;  %v313_v48 = vmul.f32 %v356_v44, %v298_v10 }
 0x23b   :  { %v437_v11 = vpop.eup %436  ;;  %v314_v12 = vmul.f32 %v356_v44, %v299_v42 }
 0x23c   :  { %v328_v13 = vadd.f32 %v357_v51, %v313_v48  ;;  %v300_v14 = vmul.f32 %v437_v11, %v531_v57 }
 0x23d   :  { %v329_v15 = vadd.f32 %v357_v51, %v314_v12 }
 0x23e   :  { %336 = vst [vmem:[%s582_s5 + $0x28] sm:$0xff] %v328_v13  ;;  %v315_v52 = vmul.f32 %v356_v44, %v300_v14 }
 0x23f   :  { %337 = vst [vmem:[%s582_s5 + $0x30] sm:$0xff] %v329_v15 }
 0x240   :  { %v330_v56 = vadd.f32 %v357_v51, %v315_v52 }
 0x242   :  { %338 = vst [vmem:[%s582_s5 + $0x38] sm:$0xff] %v330_v56 }

</bundles_post_ra>
